<compile_context>
chip_gen: v6e
topology: v6e:2x2x1
jax: 0.10.0
libtpu: 0.0.40
codegen_flags: <defaults>
</compile_context>

<pallas_src>
import functools

import jax
import jax.numpy as jnp
from jax import lax
from jax.experimental import pallas as pl
from jax.experimental.pallas import tpu as pltpu


def _hash_u32(idx_u32, seed_u32):
    """splitmix32-style finalizer on uint32 (pure VPU integer ops, interpret-safe)."""
    z = idx_u32 * jnp.uint32(0x9E3779B9) + seed_u32
    z = z ^ (z >> 16)
    z = z * jnp.uint32(0x7FEB352D)
    z = z ^ (z >> 15)
    z = z * jnp.uint32(0x846CA68B)
    z = z ^ (z >> 16)
    return z


def _pos_emb_kernel(ids_ref, seed_ref, word_ref, pos_ref, o_ref, gath_ref, *,
                    seq_len, n_emb, dim, dropout_p, training):
    # ids_ref : (B*L,) int32 in SMEM (scalar prefetch)
    # seed_ref: (1,)   int32 in SMEM (scalar prefetch)
    # word_ref: (n_emb, D) f32 VMEM  (constant index map -> fetched once)
    # pos_ref : (L, D)     f32 VMEM  (only the rows actually used)
    # o_ref   : (1, L, D)  f32 VMEM  (one batch row of output)
    # gath_ref: (L, D)     f32 VMEM scratch (gathered word-embedding rows)
    b = pl.program_id(0)
    base = b * seq_len

    # Word-embedding gather: L dynamic row loads (no MXU / one-hot work).
    # seq_len is compile-time static, so this unrolls and stays LLO-visible.
    for t in range(seq_len):
        tok = ids_ref[base + t]
        tok = jnp.clip(tok, 0, n_emb - 1)          # guard OOB ids (nn.Embedding would error)
        gath_ref[pl.ds(t, 1), :] = word_ref[pl.ds(tok, 1), :]

    emb = gath_ref[...] + pos_ref[...]             # (L, D), lane-dense when D % 128 == 0

    if training and dropout_p > 0.0:
        # Inverted dropout via counter-based hash + integer threshold compare:
        # one compare + one select + one scale on the VPU.
        row = lax.broadcasted_iota(jnp.int32, (seq_len, dim), 0)
        col = lax.broadcasted_iota(jnp.int32, (seq_len, dim), 1)
        elem = ((base + row) * dim + col).astype(jnp.uint32)   # unique id per output element
        bits = _hash_u32(elem, seed_ref[0].astype(jnp.uint32))
        threshold = jnp.uint32(min(int(dropout_p * (2 ** 32)), 2 ** 32 - 1))
        keep = bits >= threshold                               # P(drop) = dropout_p
        emb = jnp.where(keep, emb * (1.0 / (1.0 - dropout_p)), 0.0)

    o_ref[0, :, :] = emb.astype(o_ref.dtype)


def position_embedding_forward(x, word_table, pos_table, *, dropout_p=0.1,
                               training=False, seed=0):
    """Forward pass of PositionEmbedding.

    x          : (B, L) int token ids
    word_table : (n_emb, D) float32
    pos_table  : (max_len, D) float32
    returns    : (B, L, D) float32
    """
    B, L = x.shape
    n_emb, D = word_table.shape
    max_len, D2 = pos_table.shape
    assert D == D2, "embedding dims must match"
    assert L <= max_len, "sequence length exceeds max_len"
    assert 0.0 <= dropout_p < 1.0
    # (8, 128) tiling rule for the (L, D) pos block (pad L to a multiple of 8 otherwise).
    assert L % 8 == 0 or L == max_len, "pad seq_len to a multiple of 8"

    ids_flat = x.astype(jnp.int32).reshape(B * L)          # scalar-prefetch data (SMEM)
    seed_arr = jnp.asarray([seed], dtype=jnp.int32)

    kernel = functools.partial(
        _pos_emb_kernel, seq_len=L, n_emb=n_emb, dim=D,
        dropout_p=float(dropout_p), training=bool(training))

    grid_spec = pltpu.PrefetchScalarGridSpec(
        num_scalar_prefetch=2,                              # ids + seed
        grid=(B,),                                          # one batch row per step
        in_specs=[
            # Full word table, constant block index -> DMA'd once, reused across steps.
            pl.BlockSpec((n_emb, D), lambda b, ids, seed: (0, 0)),
            # Only the first L rows of the positional table.
            pl.BlockSpec((L, D), lambda b, ids, seed: (0, 0)),
        ],
        out_specs=pl.BlockSpec((1, L, D), lambda b, ids, seed: (b, 0, 0)),
        scratch_shapes=[pltpu.VMEM((L, D), jnp.float32)],
    )

    return pl.pallas_call(
        kernel,
        out_shape=jax.ShapeDtypeStruct((B, L, D), jnp.float32),
        grid_spec=grid_spec,
        compiler_params=pltpu.CompilerParams(
            dimension_semantics=("parallel",)),             # batch rows are independent
    )(ids_flat, seed_arr, word_table, pos_table)


if __name__ == "__main__":
    # Small shapes consistent with the module (dim default 256 -> scaled to a still
    # lane-dense 128): batch=2, seq=8, dim=128, vocab=64, max_len=128.
    B, L, D, N_EMB, MAX_LEN = 2, 8, 128, 64, 128
    P = 0.1

    key = jax.random.PRNGKey(0)
    k_word, k_pos, k_ids = jax.random.split(key, 3)
    word_table = jax.random.normal(k_word, (N_EMB, D), dtype=jnp.float32)
    pos_table = jax.random.normal(k_pos, (MAX_LEN, D), dtype=jnp.float32)
    x = jax.random.randint(k_ids, (B, L), 0, N_EMB, dtype=jnp.int32)

    ref = word_table[x] + pos_table[:L][None, :, :]

    # Eval mode: dropout is identity -> must match the pure-JAX reference.
    out = jax.block_until_ready(
        position_embedding_forward(x, word_table, pos_table,
                                   dropout_p=P, training=False))
    assert out.shape == (B, L, D)
    assert jnp.allclose(out, ref, atol=1e-5, rtol=1e-5), "eval kernel != reference"

    # Training mode: every element must be 0 (dropped) or ref/(1-p) (kept).
    out_tr = jax.block_until_ready(
        position_embedding_forward(x, word_table, pos_table,
                                   dropout_p=P, training=True, seed=42))
    assert out_tr.shape == (B, L, D)
    scaled = ref / (1.0 - P)
    ok = jnp.isclose(out_tr, scaled, atol=1e-5, rtol=1e-5) | (out_tr == 0.0)
    assert bool(jnp.all(ok)), "training-mode values not in {0, ref/(1-p)}"
    drop_frac = float(jnp.mean((out_tr == 0.0).astype(jnp.float32)))
    assert 0.0 < drop_frac < 0.35, f"implausible drop fraction {drop_frac}"

    print("KERNEL_OK")
</pallas_src>

<mosaic_0001>
module attributes {stable_mosaic.version = 11 : i64} {
  func.func @_pos_emb_kernel(%arg0: i32, %arg1: memref<16xi32, #tpu.memory_space<smem>>, %arg2: memref<1xi32, #tpu.memory_space<smem>>, %arg3: memref<64x128xf32, #tpu.memory_space<vmem>>, %arg4: memref<8x128xf32, #tpu.memory_space<vmem>>, %arg5: memref<1x8x128xf32, #tpu.memory_space<vmem>>, %arg6: memref<8x128xf32, #tpu.memory_space<vmem>>) attributes {dimension_semantics = [#tpu.dimension_semantics<parallel>], iteration_bounds = array<i64: 2>, scalar_prefetch = 2 : i64, scratch_operands = 1 : i64, tpu.core_type = #tpu.core_type<tc>, window_params = [{pipeline_mode = #tpu.pipeline_mode<synchronous>, transform_indices = @transform_0, window_bounds = array<i64: 64, 128>}, {transform_indices = @transform_1, window_bounds = array<i64: 8, 128>}, {transform_indices = @transform_2, window_bounds = array<i64: 1, 8, 128>}]} {
    %c8_i32 = arith.constant 8 : i32
    %0 = arith.muli %arg0, %c8_i32 : i32
    %c0_i32 = arith.constant 0 : i32
    %1 = arith.addi %0, %c0_i32 : i32
    %2 = arith.index_cast %1 : i32 to index
    %3 = memref.load %arg1[%2] : memref<16xi32, #tpu.memory_space<smem>>
    %c0_i32_0 = arith.constant 0 : i32
    %c63_i32 = arith.constant 63 : i32
    %4 = arith.maxsi %c0_i32_0, %3 : i32
    %5 = arith.minsi %c63_i32, %4 : i32
    %6 = arith.index_cast %5 : i32 to index
    %c0 = arith.constant 0 : index
    %7 = vector.load %arg3[%6, %c0] : memref<64x128xf32, #tpu.memory_space<vmem>>, vector<1x128xf32>
    %c0_1 = arith.constant 0 : index
    %c0_2 = arith.constant 0 : index
    %8 = vector.load %arg6[%c0_1, %c0_2] : memref<8x128xf32, #tpu.memory_space<vmem>>, vector<1x128xf32>
    tpu.vector_store %arg6[%c0_1, %c0_2], %7 {strides = array<i32>} : memref<8x128xf32, #tpu.memory_space<vmem>>, vector<1x128xf32>,
    %c1_i32 = arith.constant 1 : i32
    %9 = arith.addi %0, %c1_i32 : i32
    %10 = arith.index_cast %9 : i32 to index
    %11 = memref.load %arg1[%10] : memref<16xi32, #tpu.memory_space<smem>>
    %c0_i32_3 = arith.constant 0 : i32
    %c63_i32_4 = arith.constant 63 : i32
    %12 = arith.maxsi %c0_i32_3, %11 : i32
    %13 = arith.minsi %c63_i32_4, %12 : i32
    %14 = arith.index_cast %13 : i32 to index
    %c0_5 = arith.constant 0 : index
    %15 = vector.load %arg3[%14, %c0_5] : memref<64x128xf32, #tpu.memory_space<vmem>>, vector<1x128xf32>
    %c1 = arith.constant 1 : index
    %c0_6 = arith.constant 0 : index
    %16 = vector.load %arg6[%c1, %c0_6] : memref<8x128xf32, #tpu.memory_space<vmem>>, vector<1x128xf32>
    tpu.vector_store %arg6[%c1, %c0_6], %15 {strides = array<i32>} : memref<8x128xf32, #tpu.memory_space<vmem>>, vector<1x128xf32>,
    %c2_i32 = arith.constant 2 : i32
    %17 = arith.addi %0, %c2_i32 : i32
    %18 = arith.index_cast %17 : i32 to index
    %19 = memref.load %arg1[%18] : memref<16xi32, #tpu.memory_space<smem>>
    %c0_i32_7 = arith.constant 0 : i32
    %c63_i32_8 = arith.constant 63 : i32
    %20 = arith.maxsi %c0_i32_7, %19 : i32
    %21 = arith.minsi %c63_i32_8, %20 : i32
    %22 = arith.index_cast %21 : i32 to index
    %c0_9 = arith.constant 0 : index
    %23 = vector.load %arg3[%22, %c0_9] : memref<64x128xf32, #tpu.memory_space<vmem>>, vector<1x128xf32>
    %c2 = arith.constant 2 : index
    %c0_10 = arith.constant 0 : index
    %24 = vector.load %arg6[%c2, %c0_10] : memref<8x128xf32, #tpu.memory_space<vmem>>, vector<1x128xf32>
    tpu.vector_store %arg6[%c2, %c0_10], %23 {strides = array<i32>} : memref<8x128xf32, #tpu.memory_space<vmem>>, vector<1x128xf32>,
    %c3_i32 = arith.constant 3 : i32
    %25 = arith.addi %0, %c3_i32 : i32
    %26 = arith.index_cast %25 : i32 to index
    %27 = memref.load %arg1[%26] : memref<16xi32, #tpu.memory_space<smem>>
    %c0_i32_11 = arith.constant 0 : i32
    %c63_i32_12 = arith.constant 63 : i32
    %28 = arith.maxsi %c0_i32_11, %27 : i32
    %29 = arith.minsi %c63_i32_12, %28 : i32
    %30 = arith.index_cast %29 : i32 to index
    %c0_13 = arith.constant 0 : index
    %31 = vector.load %arg3[%30, %c0_13] : memref<64x128xf32, #tpu.memory_space<vmem>>, vector<1x128xf32>
    %c3 = arith.constant 3 : index
    %c0_14 = arith.constant 0 : index
    %32 = vector.load %arg6[%c3, %c0_14] : memref<8x128xf32, #tpu.memory_space<vmem>>, vector<1x128xf32>
    tpu.vector_store %arg6[%c3, %c0_14], %31 {strides = array<i32>} : memref<8x128xf32, #tpu.memory_space<vmem>>, vector<1x128xf32>,
    %c4_i32 = arith.constant 4 : i32
    %33 = arith.addi %0, %c4_i32 : i32
    %34 = arith.index_cast %33 : i32 to index
    %35 = memref.load %arg1[%34] : memref<16xi32, #tpu.memory_space<smem>>
    %c0_i32_15 = arith.constant 0 : i32
    %c63_i32_16 = arith.constant 63 : i32
    %36 = arith.maxsi %c0_i32_15, %35 : i32
    %37 = arith.minsi %c63_i32_16, %36 : i32
    %38 = arith.index_cast %37 : i32 to index
    %c0_17 = arith.constant 0 : index
    %39 = vector.load %arg3[%38, %c0_17] : memref<64x128xf32, #tpu.memory_space<vmem>>, vector<1x128xf32>
    %c4 = arith.constant 4 : index
    %c0_18 = arith.constant 0 : index
    %40 = vector.load %arg6[%c4, %c0_18] : memref<8x128xf32, #tpu.memory_space<vmem>>, vector<1x128xf32>
    tpu.vector_store %arg6[%c4, %c0_18], %39 {strides = array<i32>} : memref<8x128xf32, #tpu.memory_space<vmem>>, vector<1x128xf32>,
    %c5_i32 = arith.constant 5 : i32
    %41 = arith.addi %0, %c5_i32 : i32
    %42 = arith.index_cast %41 : i32 to index
    %43 = memref.load %arg1[%42] : memref<16xi32, #tpu.memory_space<smem>>
    %c0_i32_19 = arith.constant 0 : i32
    %c63_i32_20 = arith.constant 63 : i32
    %44 = arith.maxsi %c0_i32_19, %43 : i32
    %45 = arith.minsi %c63_i32_20, %44 : i32
    %46 = arith.index_cast %45 : i32 to index
    %c0_21 = arith.constant 0 : index
    %47 = vector.load %arg3[%46, %c0_21] : memref<64x128xf32, #tpu.memory_space<vmem>>, vector<1x128xf32>
    %c5 = arith.constant 5 : index
    %c0_22 = arith.constant 0 : index
    %48 = vector.load %arg6[%c5, %c0_22] : memref<8x128xf32, #tpu.memory_space<vmem>>, vector<1x128xf32>
    tpu.vector_store %arg6[%c5, %c0_22], %47 {strides = array<i32>} : memref<8x128xf32, #tpu.memory_space<vmem>>, vector<1x128xf32>,
    %c6_i32 = arith.constant 6 : i32
    %49 = arith.addi %0, %c6_i32 : i32
    %50 = arith.index_cast %49 : i32 to index
    %51 = memref.load %arg1[%50] : memref<16xi32, #tpu.memory_space<smem>>
    %c0_i32_23 = arith.constant 0 : i32
    %c63_i32_24 = arith.constant 63 : i32
    %52 = arith.maxsi %c0_i32_23, %51 : i32
    %53 = arith.minsi %c63_i32_24, %52 : i32
    %54 = arith.index_cast %53 : i32 to index
    %c0_25 = arith.constant 0 : index
    %55 = vector.load %arg3[%54, %c0_25] : memref<64x128xf32, #tpu.memory_space<vmem>>, vector<1x128xf32>
    %c6 = arith.constant 6 : index
    %c0_26 = arith.constant 0 : index
    %56 = vector.load %arg6[%c6, %c0_26] : memref<8x128xf32, #tpu.memory_space<vmem>>, vector<1x128xf32>
    tpu.vector_store %arg6[%c6, %c0_26], %55 {strides = array<i32>} : memref<8x128xf32, #tpu.memory_space<vmem>>, vector<1x128xf32>,
    %c7_i32 = arith.constant 7 : i32
    %57 = arith.addi %0, %c7_i32 : i32
    %58 = arith.index_cast %57 : i32 to index
    %59 = memref.load %arg1[%58] : memref<16xi32, #tpu.memory_space<smem>>
    %c0_i32_27 = arith.constant 0 : i32
    %c63_i32_28 = arith.constant 63 : i32
    %60 = arith.maxsi %c0_i32_27, %59 : i32
    %61 = arith.minsi %c63_i32_28, %60 : i32
    %62 = arith.index_cast %61 : i32 to index
    %c0_29 = arith.constant 0 : index
    %63 = vector.load %arg3[%62, %c0_29] : memref<64x128xf32, #tpu.memory_space<vmem>>, vector<1x128xf32>
    %c7 = arith.constant 7 : index
    %c0_30 = arith.constant 0 : index
    %64 = vector.load %arg6[%c7, %c0_30] : memref<8x128xf32, #tpu.memory_space<vmem>>, vector<1x128xf32>
    tpu.vector_store %arg6[%c7, %c0_30], %63 {strides = array<i32>} : memref<8x128xf32, #tpu.memory_space<vmem>>, vector<1x128xf32>,
    %c0_31 = arith.constant 0 : index
    %c0_32 = arith.constant 0 : index
    %65 = vector.load %arg6[%c0_31, %c0_32] : memref<8x128xf32, #tpu.memory_space<vmem>>, vector<8x128xf32>
    %c0_33 = arith.constant 0 : index
    %c0_34 = arith.constant 0 : index
    %66 = vector.load %arg4[%c0_33, %c0_34] : memref<8x128xf32, #tpu.memory_space<vmem>>, vector<8x128xf32>
    %67 = arith.addf %65, %66 : vector<8x128xf32>
    %c0_35 = arith.constant 0 : index
    %c0_36 = arith.constant 0 : index
    %c0_37 = arith.constant 0 : index
    %68 = vector.load %arg5[%c0_35, %c0_36, %c0_37] : memref<1x8x128xf32, #tpu.memory_space<vmem>>, vector<1x8x128xf32>
    %69 = vector.shape_cast %68 : vector<1x8x128xf32> to vector<8x128xf32>
    %70 = vector.shape_cast %67 : vector<8x128xf32> to vector<1x8x128xf32>
    tpu.vector_store %arg5[%c0_35, %c0_36, %c0_37], %70 {strides = array<i32>} : memref<1x8x128xf32, #tpu.memory_space<vmem>>, vector<1x8x128xf32>,
    return
  }
  func.func @transform_0(%arg0: i32, %arg1: memref<16xi32, #tpu.memory_space<smem>>, %arg2: memref<1xi32, #tpu.memory_space<smem>>) -> (i32, i32) {
    %c0_i32 = arith.constant 0 : i32
    %c0_i32_0 = arith.constant 0 : i32
    %c0_i32_1 = arith.constant 0 : i32
    return %c0_i32, %c0_i32_0 : i32, i32
  }
  func.func @transform_1(%arg0: i32, %arg1: memref<16xi32, #tpu.memory_space<smem>>, %arg2: memref<1xi32, #tpu.memory_space<smem>>) -> (i32, i32) {
    %c0_i32 = arith.constant 0 : i32
    %c0_i32_0 = arith.constant 0 : i32
    %c0_i32_1 = arith.constant 0 : i32
    return %c0_i32, %c0_i32_0 : i32, i32
  }
  func.func @transform_2(%arg0: i32, %arg1: memref<16xi32, #tpu.memory_space<smem>>, %arg2: memref<1xi32, #tpu.memory_space<smem>>) -> (i32, i32, i32) {
    %c0_i32 = arith.constant 0 : i32
    %c0_i32_0 = arith.constant 0 : i32
    %c0_i32_1 = arith.constant 0 : i32
    return %arg0, %c0_i32, %c0_i32_0 : i32, i32, i32
  }
}

</mosaic_0001>

<bundles_post_ra>
// kernel: tpu_custom_call.1
= control target key start
LH: loop header
LB: loop body
LE: loop exit
PB: predicated region body
PF: predicated region fallthrough
CT: control target
= control target key end

     0   :  { %s779_s0 = inlined_call_operand.vmem [shape: s32[16], index: 0, kind: input, shape index: {}]   ;;  %s780_s1 = inlined_call_operand.<no memory space> [shape: s32[1], index: 1, kind: input, shape index: {}]   ;;  %s781_s2 = inlined_call_operand.hbm [shape: f32[64,128], index: 2, kind: input, shape index: {}]   ;;  %s782_s3 = inlined_call_operand.hbm [shape: f32[128,128], index: 3, kind: input, shape index: {}]   ;;  %s783_s4 = inlined_call_operand.hbm [shape: f32[2,8,128], index: 4, kind: output, shape index: {}]  }
   0x1   :  { %s9_s17 = sshll.u32 %s779_s0, 4  ;;  %s10_s17 = int_to_ptr.vmem [resolvable:$true] %s9_s17 }
   0x2   :  { %s458_s18 = scalar_lea.vmem %s10_s17, 16  ;;  %p463_p1 = scmp.lt.s32.totalorder %s10_s17, %s10_s17 }
   0x3   :  { %p459_p0 = scmp.ne.s32.totalorder %s10_s17, %s458_s18  ;;  %p464_p2 = scmp.lt.s32.totalorder %s458_s18, %s458_s18 }
   0x5   :  { %p465_p3 = por %p464_p2, %p463_p1 }
   0x7   :  { %p466_p4 = pnand %p465_p3, %p459_p0 }
   0x9   :  { %469 = shalt.err (!%p466_p4)  }
   0xa   :  { %s594_s1 = smov [#allocation4]  }
   0xb   :  { %12 = dma.vmem_to_smem %s10_s17, 16, %s594_s1, [#allocation3] }
   0xc   :  { %564 = dma.done.wait [#allocation3], 16 }
   0xd   :  { %565 = vsyncadd [#allocation3], 4294967280 }
   0xe   :  { %15 = sfence }
   0xf   :  { %16 = vsyncpa [#allocation7], 0 }
  0x10   :  { %17 = vsyncpa [#allocation10], 0 }
  0x11   :  { %18 = vsyncpa [#allocation8], 0 }
  0x12   :  { %20 = vsyncpa [#allocation8 + $0x1], 0  ;;  %s628_s19 = smov 0   ;;  %s630_s0 = smov 0  }
  0x13   :  { %s632_s20 = smov 0   ;;  %s634_s21 = smov 0  }
  0x14 LB: > { %s649_s22 = sadd.s32 4294967295, %s592_s21   ;;  %s326_s23 = sadd.s32 4294967294, %s592_s21   ;;  %s592_s21 = sphi %s634_s21, %s797_s21   ;;  %s588_s20 = sphi %s632_s20, %s796_s20   ;;  %s584_s0 = sphi %s630_s0, %s795_s0   ;;  %s580_s19 = sphi %s628_s19, %s794_s19  }
  0x15   : > { %s653_s24 = sadd.s32 1, %s592_s21   ;;  %s75_s25 = sadd.s32 1, %s588_s20 }
  0x16   : > { %s72_s26 = ssub.s32 %s592_s21, %s653_s24  ;;  %p85_p5 = scmp.ne.s32.totalorder %s588_s20, %s584_s0 }
  0x17   : > { %p73_p6 = scmp.eq.s32.totalorder %s72_s26, 0  ;;  %p86_p7 = scmp.eq.s32.totalorder %s649_s22, 1 }
  0x18   : > { %p91_p8 = scmp.ne.s32.totalorder %s584_s0, %s580_s19  ;;  %p92_p9 = scmp.eq.s32.totalorder %s326_s23, 1 }
  0x19   : > { %s664_s27 = scalar_select %p73_p6, %s588_s20, %s75_s25  }
  0x1a   : > { %p666_p10 = por %p86_p7, %p85_p5  ;;  %p670_p11 = por %p92_p9, %p91_p8 }
  0x1b   : > { %p327_p12 = scmp.ge.s32.totalorder %s592_s21, 1  ;;  %p99_p13 = scmp.lt.s32.totalorder %s592_s21, 3 }
  0x1c   : > { %s786_s29 = scalar_select %p670_p11, 1, 0 }
  0x1d   : > { %p784_p0 = scmp.eq.s32.totalorder %s649_s22, 0  ;;  %p677_p1 = pnand %p327_p12, %p99_p13 }
  0x1e   : > { %s595_s5 = smov [#allocation6]   ;;  %s596_s8 = smov [#allocation9]  }
  0x1f   : > { %s111_s6 = sshll.u32 %s595_s5, 4  ;;  %p405_p2 = pneg %p677_p1  ;;  %s112_s6 = int_to_ptr.vmem [resolvable:$true] %s111_s6 }
  0x20   : > { %s125_s9 = sshll.u32 %s596_s8, 4  ;;  %s481_s10 = scalar_lea.vmem %s112_s6, 1024  ;;  %s126_s9 = int_to_ptr.vmem [resolvable:$true] %s125_s9 }
  0x21   : > { %p685_p3 = pnand %p784_p0, %p405_p2  ;;  %p482_p5 = scmp.ne.s32.totalorder %s112_s6, %s481_s10 }
  0x22   : > { %p489_p8 = scmp.lt.s32.totalorder %s112_s6, %s112_s6  ;;  %p490_p9 = scmp.lt.s32.totalorder %s481_s10, %s481_s10 }
  0x23   : > { %p472_p4 = pneg %p685_p3 }
  0x24   : > { %p491_p12 = por %p490_p9, %p489_p8 }
  0x25   : > { %p484_p6 = pnand %p482_p5, %p472_p4 }
  0x27   : > { %p485_p7 = pneg %p484_p6 }
  0x29   : > { %p492_p13 = pnand %p491_p12, %p485_p7 }
  0x2b   : > { %495 = shalt.err (!%p492_p13)
}
  0x2c   : > { %s597_s11 = smov 128   ;;  %s598_s12 = smov 8  }
  0x2d   : > { %408 = dma.hbm_to_vmem [thread:$0]  (!%p685_p3), %s781_s2, 1024, %s112_s6, [#allocation7], %s597_s11, %s597_s11, %s598_s12  }
  0x2e   : > { %s507_s15 = scalar_lea.vmem %s126_s9, 128  ;;  %p515_p0 = scmp.lt.s32.totalorder %s126_s9, %s126_s9 }
  0x2f   : > { %p508_p2 = scmp.ne.s32.totalorder %s126_s9, %s507_s15  ;;  %p516_p11 = scmp.lt.s32.totalorder %s507_s15, %s507_s15 }
  0x31   : > { %p510_p5 = pnand %p508_p2, %p472_p4  ;;  %p517_p8 = por %p516_p11, %p515_p0 }
  0x33   : > { %p511_p6 = pneg %p510_p5 }
  0x35   : > { %p518_p7 = pnand %p517_p8, %p511_p6 }
  0x37   : > { %521 = shalt.err (!%p518_p7)
}
  0x38   : > { %411 = dma.hbm_to_vmem [thread:$0]  (!%p685_p3), %s782_s3, 128, %s126_s9, [#allocation10]  }
  0x39   : > { %138 = sbr.rel (%p677_p1) target bundleno = 125 (0x7d), region = 28  ;;  %p789_p9 = scmp.eq.s32.totalorder (!%p677_p1), %s649_s22, 0 }
  0x3e   : > { %567 = dma.done.wait (%p789_p9), [#allocation7], 1024   ;;  %p790_p4 = pmov %p789_p9 }
  0x40   : > { %569 = vsyncadd (%p790_p4), [#allocation7], 4294966272  ;;  %p791_p12 = pmov %p790_p4 }
  0x41   : > { %p792_p11 = pmov %p790_p4 }
  0x42   : > { %571 = dma.done.wait (%p791_p12), [#allocation10], 128  }
  0x43   : > { %573 = vsyncadd (%p792_p11), [#allocation10], 4294967168  ;;  %s718_s18 = sshll.u32 %s649_s22, 3  ;;  %v232_v8 = vld [vmem:[#allocation9] sm:$0xff] }
  0x44   : > { %s160_s1 = sld [smem:[#allocation4 + %s718_s18]]  ;;  %s168_s23 = sadd.s32 1, %s718_s18 }
  0x45   : > { %s169_s25 = sld [smem:[#allocation4 + %s168_s23]]  ;;  %s177_s26 = sadd.s32 2, %s718_s18 }
  0x46   : > { %s178_s30 = sld [smem:[#allocation4 + %s177_s26]]  ;;  %s186_s5 = sadd.s32 3, %s718_s18 }
  0x47   : > { %s724_s6 = sld [smem:[#allocation4 + %s186_s5]]  ;;  %s195_s7 = sadd.s32 4, %s718_s18 }
  0x48   : > { %s727_s8 = sld [smem:[#allocation4 + %s195_s7]]  ;;  %s204_s9 = sadd.s32 5, %s718_s18 }
  0x49   : > { %s730_s10 = sld [smem:[#allocation4 + %s204_s9]]  ;;  %s213_s11 = sadd.s32 6, %s718_s18 }
  0x4a   : > { %p161_p0 = scmp.gt.s32.totalorder %s160_s1, 0  ;;  %p335_p1 = scmp.lt.s32.totalorder %s160_s1, 63 }
  0x4b   : > { %p170_p3 = scmp.gt.s32.totalorder %s169_s25, 0  ;;  %p340_p13 = scmp.lt.s32.totalorder %s169_s25, 63 }
  0x4c   : > { %s799_s1 = smov (!%p161_p0, %s160_s1), 0  ;;  %p179_p2 = scmp.gt.s32.totalorder %s178_s30, 0 }
  0x4d   : > { %s801_s25 = smov (!%p170_p3, %s169_s25), 0  ;;  %s803_s1 = smov (!%p335_p1, %s799_s1), 63 }
  0x4e   : > { %s805_s25 = smov (!%p340_p13, %s801_s25), 63  ;;  %s165_s12 = scalar_lea.vmem [#allocation6], %s803_s1 }
  0x4f   : > { %v166_v0 = vld [vmem:[%s165_s12] sm:$0x1]  ;;  %p345_p5 = scmp.lt.s32.totalorder %s178_s30, 63  ;;  %s174_s13 = scalar_lea.vmem [#allocation6], %s805_s25 }
  0x50   : > { %167 = vst [vmem:[#allocation2] sm:$0x1] %v166_v0  ;;  %v175_v1 = vld [vmem:[%s174_s13] sm:$0x1]  ;;  %s807_s30 = smov (!%p179_p2, %s178_s30), 0  ;;  %p188_p6 = scmp.gt.s32.totalorder %s724_s6, 0 }
  0x51   : > { %176 = vst [vmem:[#allocation2 + $0x1] sm:$0x1] %v175_v1  ;;  %p350_p8 = scmp.lt.s32.totalorder %s724_s6, 63  ;;  %s809_s30 = smov (!%p345_p5, %s807_s30), 63 }
  0x52   : > { %s811_s6 = smov (!%p188_p6, %s724_s6), 0  ;;  %p197_p7 = scmp.gt.s32.totalorder %s727_s8, 0 }
  0x53   : > { %s183_s14 = scalar_lea.vmem [#allocation6], %s809_s30  ;;  %s813_s6 = smov (!%p350_p8, %s811_s6), 63 }
  0x54   : > { %v184_v2 = vld [vmem:[%s183_s14] sm:$0x1]  ;;  %s198_s15 = scalar_select %p197_p7, %s727_s8, 0 }
  0x55   : > { %185 = vst [vmem:[#allocation2 + $0x2] sm:$0x1] %v184_v2  ;;  %p355_p9 = scmp.lt.s32.totalorder %s727_s8, 63  ;;  %s192_s16 = scalar_lea.vmem [#allocation6], %s813_s6 }
  0x56   : > { %v193_v3 = vld [vmem:[%s192_s16] sm:$0x1]  ;;  %p206_p4 = scmp.gt.s32.totalorder %s730_s10, 0  ;;  %p360_p12 = scmp.lt.s32.totalorder %s730_s10, 63 }
  0x57   : > { %194 = vst [vmem:[#allocation2 + $0x3] sm:$0x1] %v193_v3  ;;  %s815_s15 = smov (!%p355_p9, %s198_s15), 63  ;;  %s214_s17 = sld [smem:[#allocation4 + %s213_s11]] }
  0x58   : > { %s817_s10 = smov (!%p206_p4, %s730_s10), 0  ;;  %s201_s1 = scalar_lea.vmem [#allocation6], %s815_s15 }
  0x59   : > { %v202_v4 = vld [vmem:[%s201_s1] sm:$0x1]  ;;  %s819_s10 = smov (!%p360_p12, %s817_s10), 63  ;;  %s222_s23 = sadd.s32 7, %s718_s18 }
  0x5a   : > { %203 = vst [vmem:[#allocation2 + $0x4] sm:$0x1] %v202_v4  ;;  %s223_s25 = sld [smem:[#allocation4 + %s222_s23]]  ;;  %s210_s26 = scalar_lea.vmem [#allocation6], %s819_s10 }
  0x5b   : > { %v211_v5 = vld [vmem:[%s210_s26] sm:$0x1]  ;;  %s156_s30 = sand.u32 1, %s584_s0   ;;  %s376_s9 = sshll.u32 %s649_s22, 7 }
  0x5c   : > { %212 = vst [vmem:[#allocation2 + $0x5] sm:$0x1] %v211_v5  ;;  %s333_s18 = sshll.u32 %s156_s30, 3  ;;  %s247_s12 = scalar_lea.hbm %s783_s4, %s376_s9 }
  0x5d   : > { %p215_p11 = scmp.gt.s32.totalorder %s214_s17, 0  ;;  %p365_p0 = scmp.lt.s32.totalorder %s214_s17, 63 }
  0x5e   : > { %s158_s7 = scalar_lea.vmem [#allocation11], %s333_s18  ;;  %s236_s13 = scalar_lea.sflag [#allocation8], %s156_s30 }
  0x5f   : > { %s821_s17 = smov (!%p215_p11, %s214_s17), 0  ;;  %s249_s8 = sshll.u32 %s158_s7, 4  ;;  %s250_s8 = int_to_ptr.vmem [resolvable:$true] %s249_s8 }
  0x60   : > { %p224_p1 = scmp.gt.s32.totalorder %s223_s25, 0  ;;  %p370_p3 = scmp.lt.s32.totalorder %s223_s25, 63 }
  0x61   : > { %s823_s17 = smov (!%p365_p0, %s821_s17), 63  ;;  %s522_s14 = scalar_lea.vmem %s250_s8, 128 }
  0x62   : > { %s825_s25 = smov (!%p224_p1, %s223_s25), 0  ;;  %s219_s5 = scalar_lea.vmem [#allocation6], %s823_s17 }
  0x63   : > { %v220_v6 = vld [vmem:[%s219_s5] sm:$0x1]  ;;  %s827_s25 = smov (!%p370_p3, %s825_s25), 63  ;;  %p523_p13 = scmp.ne.s32.totalorder %s250_s8, %s522_s14 }
  0x64   : > { %221 = vst [vmem:[#allocation2 + $0x6] sm:$0x1] %v220_v6  ;;  %s228_s6 = scalar_lea.vmem [#allocation6], %s827_s25  ;;  %s599_s15 = smov [#allocation11]  }
  0x65   : > { %v229_v7 = vld [vmem:[%s228_s6] sm:$0x1]  ;;  %p524_p2 = pnand %p523_p13, %p666_p10  ;;  %s526_s16 = sshll.u32 %s599_s15, 4  ;;  %s527_s16 = int_to_ptr.vmem [resolvable:$false] %s526_s16 }
  0x66   : > { %230 = vst [vmem:[#allocation2 + $0x7] sm:$0x1] %v229_v7  ;;  %s528_s17 = scalar_lea.vmem %s527_s16, 256  ;;  %p529_p6 = scmp.lt.s32.totalorder %s250_s8, %s527_s16 }
  0x67   : > { %p525_p5 = pneg %p524_p2  ;;  %p530_p8 = scmp.lt.s32.totalorder %s528_s17, %s522_s14 }
  0x69   : > { %p531_p7 = por %p530_p8, %p529_p6 }
  0x6b   : > { %p532_p9 = pnand %p531_p7, %p525_p5 }
  0x6d   : > { %v231_v9 = vld [vmem:[#allocation2] sm:$0xff] }
  0x6e   : > { %v233_v10 = vadd.f32 %v232_v8, %v231_v9 }
  0x70   : > { %234 = vst [vmem:[%s158_s7] sm:$0xff] %v233_v10 }
  0x71   : > { %535 = shalt.err (!%p532_p9)
}
  0x72   : > { %s536_s22 = scalar_lea.hbm %s247_s12, 128  ;;  %s540_s25 = scalar_lea.hbm %s783_s4, 256 }
  0x73   : > { %p537_p4 = scmp.ne.s32.totalorder %s247_s12, %s536_s22  ;;  %p541_p0 = scmp.lt.s32.totalorder %s247_s12, %s783_s4 }
  0x74   : > { %p542_p1 = scmp.lt.s32.totalorder %s540_s25, %s536_s22 }
  0x75   : > { %p538_p12 = pnand %p537_p4, %p666_p10 }
  0x76   : > { %p543_p3 = por %p542_p1, %p541_p0 }
  0x77   : > { %p539_p11 = pneg %p538_p12 }
  0x79   : > { %p544_p13 = pnand %p543_p3, %p539_p11 }
  0x7b   : > { %547 = shalt.err (!%p544_p13)
}
  0x7c   : > { %403 = dma.vmem_to_hbm [thread:$0]  (%p666_p10), %s250_s8, 128, %s247_s12, %s236_s13  }
  0x7d PF: > { %p420_p2 = scmp.ge.s32.totalorder %s592_s21, 2  ;;  %s261_s5 = sand.u32 1, %s580_s19  }
  0x7e   : > { %p793_p5 = scmp.ne.s32.totalorder %s786_s29, 0  ;;  %s262_s6 = scalar_lea.sflag [#allocation8], %s261_s5 }
  0x80   : > { %p413_p6 = pnand %p420_p2, %p793_p5 }
  0x82   : > { %p414_p8 = pneg %p413_p6 }
  0x84   : > { %575 = dma.done.wait (%p414_p8), %s262_s6, 128  }
  0x85   : > { %577 = vsyncadd (%p414_p8), %s262_s6, 4294967168  ;;  %p23_p7 = scmp.ge.s32.totalorder %s653_s24, 4   ;;  %s794_s19 = smov %s584_s0 }
  0x86   : > { %s795_s0 = smov %s588_s20  ;;  %s796_s20 = smov %s664_s27 }
  0x87   : > { %s797_s21 = smov %s653_s24  ;;  %25 = sbr.rel (!%p23_p7) target bundleno = 20 (0x14), region = 77 }
  0x8c   :  { %267 = vsyncpa [#allocation7], 1 }
  0x8d   :  { %269 = vsyncpa [#allocation7 + $0x1], 1 }
  0x8e   :  { %270 = vsyncpa [#allocation10], 1 }
  0x8f   :  { %271 = vsyncpa [#allocation8], 1 }
  0x90   :  { %273 = vsyncpa [#allocation8 + $0x1], 1 }

</bundles_post_ra>
